<compile_context>
chip_gen: v6e
topology: v6e:2x2x1
jax: 0.10.0
libtpu: 0.0.40
codegen_flags: <defaults>
</compile_context>

<pallas_src>
from functools import partial

import jax
import jax.numpy as jnp
from jax.experimental import pallas as pl
from jax.experimental.pallas import tpu as pltpu


def _round_up(x, m):
    return (x + m - 1) // m * m


def _critic_fused_kernel(state_ref, action_ref, p_ref, q_ref,
                         *, S, A, S_pad, A_pad, W):
    """Fused twin-Q forward.  p_ref row layout (all lane width W = 2*max(H)):
         [0            , S_pad)        : layer-1 weight, state rows   (zero-padded)
         [S_pad        , S_pad+A_pad)  : layer-1 weight, action rows  (zero-padded)
         [off_w2       , off_w2 + W)   : layer-2 block-diagonal weight
         [off_w3       , off_w3 + W)   : layer-3 weight (cols 0,1 meaningful)
         [off_b        , off_b + 3)    : bias rows b1f, b2f, b3f
    """
    off_w1a = S_pad
    off_w2 = S_pad + A_pad
    off_w3 = off_w2 + W
    off_b = off_w3 + W

    # layer 1: sa @ W1f + b1f  (concat folded into two matmuls, no HBM concat)
    h = (jnp.dot(state_ref[...], p_ref[0:S, :],
                 preferred_element_type=jnp.float32)
         + jnp.dot(action_ref[...], p_ref[off_w1a:off_w1a + A, :],
                   preferred_element_type=jnp.float32)
         + p_ref[off_b:off_b + 1, :])
    h = jnp.maximum(h, 0.0)

    # layer 2: block-diag keeps the two heads independent
    h = (jnp.dot(h, p_ref[off_w2:off_w2 + W, :],
                 preferred_element_type=jnp.float32)
         + p_ref[off_b + 1:off_b + 2, :])
    h = jnp.maximum(h, 0.0)

    # layer 3: columns 0/1 of the result are q1/q2 (rest is exact zeros)
    q = (jnp.dot(h, p_ref[off_w3:off_w3 + W, :],
                 preferred_element_type=jnp.float32)
         + p_ref[off_b + 2:off_b + 3, :])
    q_ref[...] = q[:, 0:2].astype(q_ref.dtype)


def critic_forward(state, action, packed_params):
    """Pallas equivalent of Critic.forward(state, action) -> (q1, q2)."""
    B, S = state.shape
    A = action.shape[1]
    W = packed_params.shape[1]          # = 2 * max(hidden_sizes)
    S_pad = _round_up(S, 8)
    A_pad = _round_up(A, 8)

    flops = 2 * B * ((S + A) * W + W * W + W * W) + 4 * B * W
    bytes_accessed = 4 * (state.size + action.size + packed_params.size + B * 2)

    vmem = pl.BlockSpec(memory_space=pltpu.MemorySpace.VMEM)
    q = pl.pallas_call(
        partial(_critic_fused_kernel, S=S, A=A, S_pad=S_pad, A_pad=A_pad, W=W),
        out_shape=jax.ShapeDtypeStruct((B, 2), jnp.float32),
        in_specs=[vmem, vmem, vmem],
        out_specs=vmem,
        cost_estimate=pl.CostEstimate(flops=flops, transcendentals=0,
                                      bytes_accessed=bytes_accessed),
    )(state, action, packed_params)
    return q[:, 0:1], q[:, 1:2]


def pack_critic_params(params, state_dim, action_dim):
    """Pack the 12 per-layer tensors into one flat [rows, W] f32 buffer.

    Head fusion: layer-1 weights are concatenated along the output axis,
    layer-2 weights become a block-diagonal, layer-3 weights are stacked into
    two lanes.  Everything is lane-padded to W = 2*max(H0, H1) and row blocks
    are padded to sublane (8) multiples so in-kernel slices stay aligned.
    """
    (w1, b1, w2, b2, w3, b3, w4, b4, w5, b5, w6, b6) = params
    S, A = state_dim, action_dim
    H0 = w1.shape[1]
    H1 = w2.shape[1]
    W = 2 * max(H0, H1)
    S_pad = _round_up(S, 8)
    A_pad = _round_up(A, 8)
    f32 = jnp.float32

    # layer 1 fused: rows = input features, lanes = [head1 | head2 | zero pad]
    w1s = (jnp.zeros((S_pad, W), f32)
           .at[:S, :H0].set(w1[:S].astype(f32))
           .at[:S, H0:2 * H0].set(w4[:S].astype(f32)))
    w1a = (jnp.zeros((A_pad, W), f32)
           .at[:A, :H0].set(w1[S:].astype(f32))
           .at[:A, H0:2 * H0].set(w4[S:].astype(f32)))

    # layer 2 block-diagonal
    w2f = (jnp.zeros((W, W), f32)
           .at[:H0, :H1].set(w2.astype(f32))
           .at[H0:2 * H0, H1:2 * H1].set(w5.astype(f32)))

    # layer 3: column 0 = head1, column 1 = head2 (rest zero -> exact zeros out)
    w3f = (jnp.zeros((W, W), f32)
           .at[:H1, 0:1].set(w3.astype(f32))
           .at[H1:2 * H1, 1:2].set(w6.astype(f32)))

    # biases, one row per layer
    bf = jnp.zeros((3, W), f32)
    bf = bf.at[0, :H0].set(b1[0].astype(f32)).at[0, H0:2 * H0].set(b4[0].astype(f32))
    bf = bf.at[1, :H1].set(b2[0].astype(f32)).at[1, H1:2 * H1].set(b5[0].astype(f32))
    bf = bf.at[2, 0].set(b3[0, 0].astype(f32)).at[2, 1].set(b6[0, 0].astype(f32))

    return jnp.concatenate([w1s, w1a, w2f, w3f, bf], axis=0)


def init_critic_params(key, state_dim, action_dim, hidden_sizes):
    """Deterministic init mimicking torch.nn.Linear default
    (uniform(-1/sqrt(fan_in), 1/sqrt(fan_in)) for weight and bias).
    Weights are stored as [in, out] (transposed vs. PyTorch's [out, in])."""
    in_dim = state_dim + action_dim
    dims = [
        (in_dim, hidden_sizes[0]),          # l1
        (hidden_sizes[0], hidden_sizes[1]),  # l2
        (hidden_sizes[1], 1),               # l3
        (in_dim, hidden_sizes[0]),          # l4
        (hidden_sizes[0], hidden_sizes[1]),  # l5
        (hidden_sizes[1], 1),               # l6
    ]
    params = []
    for (fan_in, fan_out) in dims:
        key, kw, kb = jax.random.split(key, 3)
        bound = 1.0 / jnp.sqrt(jnp.float32(fan_in))
        w = jax.random.uniform(kw, (fan_in, fan_out), jnp.float32, -bound, bound)
        b = jax.random.uniform(kb, (1, fan_out), jnp.float32, -bound, bound)
        params.extend([w, b])
    return tuple(params)


def critic_forward_ref(state, action, params):
    """Pure-JAX reference (unfused) for correctness checking."""
    sa = jnp.concatenate([state, action], axis=1)
    (w1, b1, w2, b2, w3, b3, w4, b4, w5, b5, w6, b6) = params
    h1 = jax.nn.relu(sa @ w1 + b1)
    h1 = jax.nn.relu(h1 @ w2 + b2)
    q1 = h1 @ w3 + b3
    h2 = jax.nn.relu(sa @ w4 + b4)
    h2 = jax.nn.relu(h2 @ w5 + b5)
    q2 = h2 @ w6 + b6
    return q1, q2


if __name__ == "__main__":
    # Small shapes consistent with a TD3 critic.
    batch = 8
    state_dim = 12
    action_dim = 4
    hidden_sizes = (32, 32)

    key = jax.random.PRNGKey(0)
    kp, ks, ka = jax.random.split(key, 3)

    params = init_critic_params(kp, state_dim, action_dim, hidden_sizes)
    state = jax.random.normal(ks, (batch, state_dim), jnp.float32)
    action = jax.random.normal(ka, (batch, action_dim), jnp.float32)

    # Pack once (outside the per-step path).
    packed = pack_critic_params(params, state_dim, action_dim)

    q1, q2 = jax.jit(critic_forward)(state, action, packed)
    jax.block_until_ready((q1, q2))

    q1_ref, q2_ref = critic_forward_ref(state, action, params)
    assert q1.shape == (batch, 1) and q2.shape == (batch, 1)
    assert jnp.allclose(q1, q1_ref, atol=1e-4, rtol=1e-4), \
        float(jnp.max(jnp.abs(q1 - q1_ref)))
    assert jnp.allclose(q2, q2_ref, atol=1e-4, rtol=1e-4), \
        float(jnp.max(jnp.abs(q2 - q2_ref)))

    print("KERNEL_OK")
</pallas_src>

<mosaic_0001>
module attributes {stable_mosaic.version = 11 : i64} {
  func.func @_critic_fused_kernel(%arg0: memref<8x12xf32, #tpu.memory_space<vmem>>, %arg1: memref<8x4xf32, #tpu.memory_space<vmem>>, %arg2: memref<155x64xf32, #tpu.memory_space<vmem>>, %arg3: memref<8x2xf32, #tpu.memory_space<vmem>>) attributes {dimension_semantics = [], scalar_prefetch = 0 : i64, scratch_operands = 0 : i64, tpu.core_type = #tpu.core_type<tc>} {
    %c0 = arith.constant 0 : index
    %c0_0 = arith.constant 0 : index
    %0 = vector.load %arg0[%c0, %c0_0] : memref<8x12xf32, #tpu.memory_space<vmem>>, vector<8x12xf32>
    %c0_1 = arith.constant 0 : index
    %c0_2 = arith.constant 0 : index
    %1 = vector.load %arg2[%c0_1, %c0_2] : memref<155x64xf32, #tpu.memory_space<vmem>>, vector<12x64xf32>
    %cst = arith.constant dense<0.000000e+00> : vector<8x64xf32>
    %2 = tpu.matmul %0, %1, %cst {dimension_numbers = #tpu.dot_dimension_numbers<[1], [0], [0], [1], [0, 0, 1, 1], [], []>} : vector<8x12xf32>, vector<12x64xf32>, vector<8x64xf32> -> vector<8x64xf32>
    %c0_3 = arith.constant 0 : index
    %c0_4 = arith.constant 0 : index
    %3 = vector.load %arg1[%c0_3, %c0_4] : memref<8x4xf32, #tpu.memory_space<vmem>>, vector<8x4xf32>
    %c16 = arith.constant 16 : index
    %c0_5 = arith.constant 0 : index
    %4 = vector.load %arg2[%c16, %c0_5] : memref<155x64xf32, #tpu.memory_space<vmem>>, vector<4x64xf32>
    %cst_6 = arith.constant dense<0.000000e+00> : vector<8x64xf32>
    %5 = tpu.matmul %3, %4, %cst_6 {dimension_numbers = #tpu.dot_dimension_numbers<[1], [0], [0], [1], [0, 0, 1, 1], [], []>} : vector<8x4xf32>, vector<4x64xf32>, vector<8x64xf32> -> vector<8x64xf32>
    %6 = arith.addf %2, %5 : vector<8x64xf32>
    %c152 = arith.constant 152 : index
    %c0_7 = arith.constant 0 : index
    %7 = vector.load %arg2[%c152, %c0_7] : memref<155x64xf32, #tpu.memory_space<vmem>>, vector<1x64xf32>
    %8 = vector.broadcast %7 : vector<1x64xf32> to vector<8x64xf32>
    %9 = arith.addf %6, %8 : vector<8x64xf32>
    %cst_8 = arith.constant 0.000000e+00 : f32
    %10 = vector.broadcast %cst_8 : f32 to vector<8x64xf32>
    %11 = arith.maximumf %9, %10 : vector<8x64xf32>
    %c24 = arith.constant 24 : index
    %c0_9 = arith.constant 0 : index
    %12 = vector.load %arg2[%c24, %c0_9] : memref<155x64xf32, #tpu.memory_space<vmem>>, vector<64x64xf32>
    %cst_10 = arith.constant dense<0.000000e+00> : vector<8x64xf32>
    %13 = tpu.matmul %11, %12, %cst_10 {dimension_numbers = #tpu.dot_dimension_numbers<[1], [0], [0], [1], [0, 0, 1, 1], [], []>} : vector<8x64xf32>, vector<64x64xf32>, vector<8x64xf32> -> vector<8x64xf32>
    %c153 = arith.constant 153 : index
    %c0_11 = arith.constant 0 : index
    %14 = vector.load %arg2[%c153, %c0_11] : memref<155x64xf32, #tpu.memory_space<vmem>>, vector<1x64xf32>
    %15 = vector.broadcast %14 : vector<1x64xf32> to vector<8x64xf32>
    %16 = arith.addf %13, %15 : vector<8x64xf32>
    %cst_12 = arith.constant 0.000000e+00 : f32
    %17 = vector.broadcast %cst_12 : f32 to vector<8x64xf32>
    %18 = arith.maximumf %16, %17 : vector<8x64xf32>
    %c88 = arith.constant 88 : index
    %c0_13 = arith.constant 0 : index
    %19 = vector.load %arg2[%c88, %c0_13] : memref<155x64xf32, #tpu.memory_space<vmem>>, vector<64x64xf32>
    %cst_14 = arith.constant dense<0.000000e+00> : vector<8x64xf32>
    %20 = tpu.matmul %18, %19, %cst_14 {dimension_numbers = #tpu.dot_dimension_numbers<[1], [0], [0], [1], [0, 0, 1, 1], [], []>} : vector<8x64xf32>, vector<64x64xf32>, vector<8x64xf32> -> vector<8x64xf32>
    %c154 = arith.constant 154 : index
    %c0_15 = arith.constant 0 : index
    %21 = vector.load %arg2[%c154, %c0_15] : memref<155x64xf32, #tpu.memory_space<vmem>>, vector<1x64xf32>
    %22 = vector.broadcast %21 : vector<1x64xf32> to vector<8x64xf32>
    %23 = arith.addf %20, %22 : vector<8x64xf32>
    %24 = vector.extract_strided_slice %23 {offsets = [0, 0], sizes = [8, 2], strides = [1, 1]} : vector<8x64xf32> to vector<8x2xf32>
    %c0_16 = arith.constant 0 : index
    %c0_17 = arith.constant 0 : index
    %25 = vector.load %arg3[%c0_16, %c0_17] : memref<8x2xf32, #tpu.memory_space<vmem>>, vector<8x2xf32>
    tpu.vector_store %arg3[%c0_16, %c0_17], %24 {strides = array<i32>} : memref<8x2xf32, #tpu.memory_space<vmem>>, vector<8x2xf32>,
    return
  }
}

</mosaic_0001>

<bundles_post_ra>
// kernel: critic_forward.1
= control target key start
LH: loop header
LB: loop body
LE: loop exit
PB: predicated region body
PF: predicated region fallthrough
CT: control target
= control target key end

     0   :  { %vm23_vm0 = vcmask 1043456   ;;  %vm19_vm1 = vcmask 31744   ;;  %v445_v0 = vmov 0.0   ;;  %vm446_vm2 = vmmov 0   ;;  %s571_s2 = inlined_call_operand.vmem [shape: f32[155,64], index: 2, kind: input, shape index: {}]   ;;  %s572_s1 = inlined_call_operand.vmem [shape: f32[8,4], index: 1, kind: input, shape index: {}]   ;;  %s573_s0 = inlined_call_operand.vmem [shape: f32[8,12], index: 0, kind: input, shape index: {}]   ;;  %s574_s3 = inlined_call_operand.vmem [shape: f32[8,2], index: 3, kind: output, shape index: {}]  }
   0x1   :  { %393 = vmatprep.subr.mxu0 %v445_v0  ;;  %398 = vmatprep.subr.mxu1 %v445_v0  ;;  %v18_v1 = vld [vmem:[%s571_s2 + $0x10] sm:$0xf]  ;;  %v16_v2 = vld [vmem:[%s571_s2 + $0x8] sm:$0xf]  ;;  %v17_v3 = vld [vmem:[%s572_s1] sm:$0xff]  ;;  %vm97_vm3 = vcmask 97280  }
   0x2   :  { %394 = vmatpush3.msk.msra.mxu0 %vm23_vm0, %v18_v1  ;;  %395 = vmatprep.mubr.msk.f32.mxu0 %vm446_vm2, %v445_v0  ;;  %v15_v4 = vld [vmem:[%s571_s2] sm:$0xff]  ;;  %v188_v6 = vld [vmem:[%s571_s2 + $0x50] sm:$0xff]  ;;  %v187_v7 = vld [vmem:[%s571_s2 + $0x48] sm:$0xff]  ;;  %vm194_vm4 = vcmask 523264   ;;  %vm355_vm5 = vcmask 15360  }
   0x3   :  { %399 = vmatpush3.msk.msra.mxu1 %vm23_vm0, %v16_v2  ;;  %396 = vmatmul.mubr.msk.f32.vlgmr.msra.gmra.mxu0 %vm19_vm1, %v17_v3  ;;  %v14_v5 = vld [vmem:[%s573_s0] sm:$0xff]  ;;  %v185_v9 = vld [vmem:[%s571_s2 + $0x38] sm:$0xff]  ;;  %v184_v10 = vld [vmem:[%s571_s2 + $0x30] sm:$0xff] }
   0x4   :  { %400 = vmatprep.subr.mxu1 %v445_v0  ;;  %402 = vmatprep.mubr.msk.f32.mxu1 %vm446_vm2, %v445_v0  ;;  %v186_v8 = vld [vmem:[%s571_s2 + $0x40] sm:$0xff]  ;;  %v183_v11 = vld [vmem:[%s571_s2 + $0x28] sm:$0xff]  ;;  %v181_v13 = vld [vmem:[%s571_s2 + $0x18] sm:$0xff] }
   0x5   :  { %401 = vmatpush3.msra.mxu1 %v15_v4  ;;  %405 = vmatprep.subr.mxu0 %v445_v0  ;;  %v182_v12 = vld [vmem:[%s571_s2 + $0x20] sm:$0xff]  ;;  %v276_v14 = vld [vmem:[%s571_s2 + $0x90] sm:$0xff]  ;;  %v275_v15 = vld [vmem:[%s571_s2 + $0x88] sm:$0xff] }
   0x6   :  { %403 = vmatmul.mubr.msk.f32.vlgmr.msra.gmra.mxu1 %vm97_vm3, %v14_v5  ;;  %406 = vmatpush3.msra.mxu0 %v188_v6  ;;  %v274_v16 = vld [vmem:[%s571_s2 + $0x80] sm:$0xff]  ;;  %v273_v17 = vld [vmem:[%s571_s2 + $0x78] sm:$0xff]  ;;  %v272_v18 = vld [vmem:[%s571_s2 + $0x70] sm:$0xff] }
   0x7   :  { %407 = vmatprep.subr.mxu0 %v445_v0  ;;  %421 = vmatprep.mubr.msk.f32.mxu0 %vm446_vm2, %v445_v0  ;;  %v365_v22 = vld [vmem:[%s571_s2 + $0x98] ss:$0 sm:$0xff]  ;;  %v271_v27 = vld [vmem:[%s571_s2 + $0x68] sm:$0xff]  ;;  %v270_v28 = vld [vmem:[%s571_s2 + $0x60] sm:$0xff] }
   0x8   :  { %408 = vmatpush3.msra.mxu0 %v187_v7  ;;  %424 = vmatprep.subr.mxu1 %v445_v0  ;;  %v269_v29 = vld [vmem:[%s571_s2 + $0x58] sm:$0xff] }
   0x9   :  { %409 = vmatprep.subr.mxu0 %v445_v0  ;;  %440 = vmatprep.mubr.msk.f32.mxu1 %vm446_vm2, %v445_v0  ;;  %v366_v30 = vld [vmem:[%s571_s2 + $0x99] ss:$0 sm:$0xff]  ;;  %v368_v35 = vld [vmem:[%s571_s2 + $0x9a] ss:$0 sm:$0xff] }
   0xa   :  { %410 = vmatpush3.msra.mxu0 %v186_v8  ;;  %425 = vmatpush3.msra.mxu1 %v276_v14 }
   0xb   :  { %411 = vmatprep.subr.mxu0 %v445_v0  ;;  %426 = vmatprep.subr.mxu1 %v445_v0 }
   0xc   :  { %412 = vmatpush3.msra.mxu0 %v185_v9  ;;  %427 = vmatpush3.msra.mxu1 %v275_v15 }
   0xd   :  { %413 = vmatprep.subr.mxu0 %v445_v0  ;;  %428 = vmatprep.subr.mxu1 %v445_v0 }
   0xe   :  { %414 = vmatpush3.msra.mxu0 %v184_v10  ;;  %429 = vmatpush3.msra.mxu1 %v274_v16 }
   0xf   :  { %415 = vmatprep.subr.mxu0 %v445_v0  ;;  %430 = vmatprep.subr.mxu1 %v445_v0 }
  0x10   :  { %416 = vmatpush3.msra.mxu0 %v183_v11  ;;  %431 = vmatpush3.msra.mxu1 %v273_v17 }
  0x11   :  { %417 = vmatprep.subr.mxu0 %v445_v0  ;;  %432 = vmatprep.subr.mxu1 %v445_v0 }
  0x12   :  { %418 = vmatpush3.msra.mxu0 %v182_v12  ;;  %433 = vmatpush3.msra.mxu1 %v272_v18 }
  0x13   :  { %419 = vmatprep.subr.mxu0 %v445_v0  ;;  %434 = vmatprep.subr.mxu1 %v445_v0 }
  0x14   :  { %420 = vmatpush3.msra.mxu0 %v181_v13  ;;  %435 = vmatpush3.msra.mxu1 %v271_v27 }
  0x15   :  { %436 = vmatprep.subr.mxu1 %v445_v0 }
  0x16   :  { %437 = vmatpush3.msra.mxu1 %v270_v28 }
  0x17   :  { %438 = vmatprep.subr.mxu1 %v445_v0 }
  0x18   :  { %439 = vmatpush3.msra.mxu1 %v269_v29 }
  0xc3   :  { %v93_v19 = vpop.f32.mrf.mxu0 }
  0xc5   :  { %v397_v20 = vpop.f32.mrf.mxu0 }
  0xc6   :  { %v170_v21 = vpop.f32.mrf.mxu1 }
  0xc7   :  { %v171_v23 = vadd.f32 %v170_v21, %v93_v19 }
  0xc8   :  { %v404_v24 = vpop.f32.mrf.mxu1 }
  0xc9   :  { %v179_v25 = vadd.f32 %v365_v22, %v171_v23 }
  0xcb   :  { %v180_v26 = vmax.f32 %v179_v25, 0.0 }
  0xcd   :  { %422 = vmatmul.mubr.msk.f32.vlgmr.msra.gmra.mxu0 %vm194_vm4, %v180_v26 }
 0x18d   :  { %v264_v31 = vpop.f32.mrf.mxu0 }
 0x18e   :  { %v265_v32 = vadd.f32 %v366_v30, %v264_v31 }
 0x18f   :  { %v423_v33 = vpop.f32.mrf.mxu0 }
 0x190   :  { %v268_v34 = vmax.f32 %v265_v32, 0.0 }
 0x192   :  { %441 = vmatmul.mubr.msk.f32.vlgmr.msra.gmra.mxu1 %vm194_vm4, %v268_v34 }
 0x252   :  { %v351_v36 = vpop.f32.mrf.mxu1 }
 0x253   :  { %v352_v37 = vadd.f32 %v368_v35, %v351_v36 }
 0x254   :  { %v442_v38 = vpop.f32.mrf.mxu1 }
 0x255   :  { %356 = vst.msk [vmem:[%s574_s3] sm:$0xff] %vm355_vm5, %v352_v37 }

</bundles_post_ra>
